<compile_context>
chip_gen: v7x
topology: tpu7x:2x2x1
jax: 0.10.0
libtpu: 0.0.40
codegen_flags: <defaults>
</compile_context>

<pallas_src>
import functools

import jax
import jax.numpy as jnp
from jax.experimental import pallas as pl
from jax.experimental.pallas import tpu as pltpu


# ------------------------------------------------------------------
# Fused Predictor kernel: (act_fc folded into) fc1 + ReLU -> fc2
# ------------------------------------------------------------------
def _predictor_kernel(s_ref, a_ref, w1s_ref, w1a_ref, b1_ref, w2_ref, b2_ref,
                      o_ref):
    # fc1 on cat([s, act_fc(a)]) without concat and without act_fc:
    #   relu( s @ W1s  +  a @ W1a_fold  +  b1_fold )
    # The a-term has K=2, so it runs as two broadcast FMAs on the VPU (f32).
    a = a_ref[...].astype(jnp.float32)                       # (tm, 2)
    w1a = w1a_ref[...]                                       # (2, H) f32

    h = jnp.dot(s_ref[...].astype(w1s_ref.dtype), w1s_ref[...],
                preferred_element_type=jnp.float32)          # (tm, H) f32 acc
    h = h + a[:, 0:1] * w1a[0:1, :] + a[:, 1:2] * w1a[1:2, :] + b1_ref[...]
    h = jnp.maximum(h, 0.0)                                  # ReLU in f32

    out = jnp.dot(h.astype(w2_ref.dtype), w2_ref[...],
                  preferred_element_type=jnp.float32)        # (tm, R) f32 acc
    o_ref[...] = (out + b2_ref[...]).astype(o_ref.dtype)


# ------------------------------------------------------------------
# VMEM budget helper (layout-padded): re-derived so the same kernel fits
# v7x's 64 MiB physical / 32 MiB default scoped VMEM as well as v5e/v6e.
# ------------------------------------------------------------------
def _vmem_bytes_estimate(tm_eff, R, H, w_itemsize):
    pad8 = lambda n: -(-n // 8) * 8
    pad128 = lambda n: -(-n // 128) * 128
    tile = lambda r, c, b: pad8(r) * pad128(c) * b
    # double-buffered row tiles (s, a, out) + single-buffered weights/biases
    return (2 * (tile(tm_eff, R, 4) + tile(tm_eff, 2, 4) + tile(tm_eff, R, 4))
            + tile(R, H, w_itemsize) + tile(H, R, w_itemsize)
            + tile(2, H, 4) + tile(1, H, 4) + tile(1, R, 4))


def predictor_forward(kparams, s, a, *, tm=256):
    """s: (B, repr_dim), a: (B, 2)  ->  (B, repr_dim). Single fused kernel."""
    B, R = s.shape
    H = kparams["w1s"].shape[1]
    w_itemsize = jnp.dtype(kparams["w1s"].dtype).itemsize

    # --- Row-tile choice (no wrapper-side pad / slice copies) ---------------
    if B <= tm:
        # Full-extent block along the batch dim: no (8,128) constraint,
        # single grid step, nothing to pad or mask.
        tm_eff = B
    else:
        # 8-aligned tile, capped near B/2 so v7x's two TensorCores both get
        # work; a partial last block is handled by Pallas edge masking
        # (garbage-padded reads are harmless: rows are independent).
        half = (-(-((B + 1) // 2) // 8)) * 8
        tm_eff = min(tm, half)
    n_tiles = pl.cdiv(B, tm_eff)

    vmem_limit = 32 * 1024 * 1024
    assert _vmem_bytes_estimate(tm_eff, R, H, w_itemsize) < vmem_limit, (
        "row tile too large for the portable 32 MiB VMEM budget")

    weight_bytes = ((R * H + H * R) * w_itemsize + (2 * H + H + R) * 4)
    cost = pl.CostEstimate(
        flops=int(2 * B * (R * H + H * R) + 4 * B * H),
        transcendentals=0,
        bytes_accessed=int(4 * (2 * B * R + 2 * B) + weight_bytes),
    )

    const = lambda i: (0, 0)            # grid-invariant blocks
    single = pl.Buffered(1)             # no double-buffering for constants

    out = pl.pallas_call(
        _predictor_kernel,
        out_shape=jax.ShapeDtypeStruct((B, R), jnp.float32),
        grid=(n_tiles,),
        in_specs=[
            pl.BlockSpec((tm_eff, R), lambda i: (i, 0)),        # s rows
            pl.BlockSpec((tm_eff, 2), lambda i: (i, 0)),        # a rows
            pl.BlockSpec((R, H), const, pipeline_mode=single),  # fc1 W, s cols
            pl.BlockSpec((2, H), const, pipeline_mode=single),  # folded a cols
            pl.BlockSpec((1, H), const, pipeline_mode=single),  # folded fc1 b
            pl.BlockSpec((H, R), const, pipeline_mode=single),  # fc2 W
            pl.BlockSpec((1, R), const, pipeline_mode=single),  # fc2 b
        ],
        out_specs=pl.BlockSpec((tm_eff, R), lambda i: (i, 0)),
        compiler_params=pltpu.CompilerParams(
            dimension_semantics=("parallel",),
            vmem_limit_bytes=vmem_limit),
        cost_estimate=cost,
    )(s, a,
      kparams["w1s"], kparams["w1a_fold"], kparams["b1"],
      kparams["w2"], kparams["b2"])
    return out


# ------------------------------------------------------------------
# Parameters: PyTorch-layout init + one-time repack into kernel layout
# ------------------------------------------------------------------
def init_predictor_params(key, repr_dim, action_dim):
    """PyTorch nn.Linear-style init, weights stored in PyTorch (out, in) layout."""
    fc_dim = action_dim + repr_dim
    hid = repr_dim * 4

    def uinit(k, shape, fan_in):
        bound = 1.0 / jnp.sqrt(jnp.float32(fan_in))
        return jax.random.uniform(k, shape, jnp.float32, -bound, bound)

    ks = jax.random.split(key, 6)
    return {
        "w_act": uinit(ks[0], (action_dim, 2), 2),
        "b_act": uinit(ks[1], (action_dim,), 2),
        "w1": uinit(ks[2], (hid, fc_dim), fc_dim),
        "b1": uinit(ks[3], (hid,), fc_dim),
        "w2": uinit(ks[4], (repr_dim, hid), hid),
        "b2": uinit(ks[5], (repr_dim,), hid),
    }


def pack_kernel_params(p, repr_dim, action_dim, *, matmul_dtype=jnp.float32):
    """One-time hoist:
       * pre-transpose all weights to (in, out),
       * split fc1's rows into the s-part and the act_fc-part (cat = [s, a]),
       * fold act_fc INTO fc1 (exact: composition of linear maps),
       * optionally store the two big matmul weights in bf16 (v6e/v7x MXU)."""
    w1_t = p["w1"].T                                    # (R + A, 4R)
    w1s_t = w1_t[:repr_dim, :]                          # (R, 4R)
    w1a_t = w1_t[repr_dim:, :]                          # (A, 4R)
    w1a_fold = p["w_act"].T @ w1a_t                     # (2, 4R)
    b1_fold = p["b1"] + p["b_act"] @ w1a_t              # (4R,)
    return {
        "w1s":      jnp.asarray(w1s_t, matmul_dtype),
        "w1a_fold": jnp.asarray(w1a_fold, jnp.float32),
        "b1":       jnp.asarray(b1_fold.reshape(1, -1), jnp.float32),
        "w2":       jnp.asarray(p["w2"].T, matmul_dtype),
        "b2":       jnp.asarray(p["b2"].reshape(1, -1), jnp.float32),
    }


# ------------------------------------------------------------------
# Pure-JAX reference mirroring the PyTorch forward exactly
# ------------------------------------------------------------------
def predictor_reference(p, s, a):
    a_emb = a @ p["w_act"].T + p["b_act"]
    x = jnp.concatenate([s, a_emb], axis=1)
    h = jax.nn.relu(x @ p["w1"].T + p["b1"])
    return h @ p["w2"].T + p["b2"]


if __name__ == "__main__":
    # Small shapes implied by the module: s is (B, repr_dim), a is (B, 2).
    repr_dim, action_dim = 32, 16

    key = jax.random.PRNGKey(0)
    pkey, skey, akey, skey2, akey2 = jax.random.split(key, 5)
    torch_params = init_predictor_params(pkey, repr_dim, action_dim)

    # ---- Test 1: f32 weights, tiny batch -> single full-extent block ------
    B = 2
    s = jax.random.normal(skey, (B, repr_dim), jnp.float32)
    a = jax.random.normal(akey, (B, 2), jnp.float32)
    kp_f32 = pack_kernel_params(torch_params, repr_dim, action_dim)

    fwd = jax.jit(functools.partial(predictor_forward, tm=256))
    out = jax.block_until_ready(fwd(kp_f32, s, a))
    ref = jax.block_until_ready(predictor_reference(torch_params, s, a))
    assert out.shape == (B, repr_dim), out.shape
    assert jnp.allclose(out, ref, atol=1e-4, rtol=1e-4), float(
        jnp.max(jnp.abs(out - ref)))

    # ---- Test 2: bf16 matmul weights (v6e/v7x path), multi-tile grid with a
    #      partial last block (no wrapper pad/slice) ------------------------
    B2 = 300
    s2 = jax.random.normal(skey2, (B2, repr_dim), jnp.float32)
    a2 = jax.random.normal(akey2, (B2, 2), jnp.float32)
    kp_bf16 = pack_kernel_params(torch_params, repr_dim, action_dim,
                                 matmul_dtype=jnp.bfloat16)
    fwd_bf16 = jax.jit(functools.partial(predictor_forward, tm=128))
    out2 = jax.block_until_ready(fwd_bf16(kp_bf16, s2, a2))
    ref2 = jax.block_until_ready(predictor_reference(torch_params, s2, a2))
    assert out2.shape == (B2, repr_dim), out2.shape
    assert jnp.allclose(out2, ref2, atol=5e-2, rtol=5e-2), float(
        jnp.max(jnp.abs(out2 - ref2)))

    print("KERNEL_OK")
</pallas_src>

<mosaic_0001>
module attributes {stable_mosaic.version = 11 : i64} {
  func.func @_predictor_kernel(%arg0: i32, %arg1: memref<2x32xf32, #tpu.memory_space<vmem>>, %arg2: memref<2x2xf32, #tpu.memory_space<vmem>>, %arg3: memref<32x128xf32, #tpu.memory_space<vmem>>, %arg4: memref<2x128xf32, #tpu.memory_space<vmem>>, %arg5: memref<1x128xf32, #tpu.memory_space<vmem>>, %arg6: memref<128x32xf32, #tpu.memory_space<vmem>>, %arg7: memref<1x32xf32, #tpu.memory_space<vmem>>, %arg8: memref<2x32xf32, #tpu.memory_space<vmem>>) attributes {dimension_semantics = [#tpu.dimension_semantics<parallel>], iteration_bounds = array<i64: 1>, scalar_prefetch = 0 : i64, scratch_operands = 0 : i64, tpu.core_type = #tpu.core_type<tc>, window_params = [{transform_indices = @transform_0, window_bounds = array<i64: 2, 32>}, {transform_indices = @transform_1, window_bounds = array<i64: 2, 2>}, {pipeline_mode = #tpu.pipeline_mode<synchronous>, transform_indices = @transform_2, window_bounds = array<i64: 32, 128>}, {pipeline_mode = #tpu.pipeline_mode<synchronous>, transform_indices = @transform_3, window_bounds = array<i64: 2, 128>}, {pipeline_mode = #tpu.pipeline_mode<synchronous>, transform_indices = @transform_4, window_bounds = array<i64: 1, 128>}, {pipeline_mode = #tpu.pipeline_mode<synchronous>, transform_indices = @transform_5, window_bounds = array<i64: 128, 32>}, {pipeline_mode = #tpu.pipeline_mode<synchronous>, transform_indices = @transform_6, window_bounds = array<i64: 1, 32>}, {transform_indices = @transform_7, window_bounds = array<i64: 2, 32>}]} {
    %c0 = arith.constant 0 : index
    %c0_0 = arith.constant 0 : index
    %0 = vector.load %arg2[%c0, %c0_0] : memref<2x2xf32, #tpu.memory_space<vmem>>, vector<2x2xf32>
    %c0_1 = arith.constant 0 : index
    %c0_2 = arith.constant 0 : index
    %1 = vector.load %arg4[%c0_1, %c0_2] : memref<2x128xf32, #tpu.memory_space<vmem>>, vector<2x128xf32>
    %c0_3 = arith.constant 0 : index
    %c0_4 = arith.constant 0 : index
    %2 = vector.load %arg1[%c0_3, %c0_4] : memref<2x32xf32, #tpu.memory_space<vmem>>, vector<2x32xf32>
    %c0_5 = arith.constant 0 : index
    %c0_6 = arith.constant 0 : index
    %3 = vector.load %arg3[%c0_5, %c0_6] : memref<32x128xf32, #tpu.memory_space<vmem>>, vector<32x128xf32>
    %cst = arith.constant dense<0.000000e+00> : vector<2x128xf32>
    %4 = tpu.matmul %2, %3, %cst {dimension_numbers = #tpu.dot_dimension_numbers<[1], [0], [0], [1], [0, 0, 1, 1], [], []>} : vector<2x32xf32>, vector<32x128xf32>, vector<2x128xf32> -> vector<2x128xf32>
    %5 = vector.extract_strided_slice %0 {offsets = [0, 0], sizes = [2, 1], strides = [1, 1]} : vector<2x2xf32> to vector<2x1xf32>
    %6 = vector.extract_strided_slice %1 {offsets = [0, 0], sizes = [1, 128], strides = [1, 1]} : vector<2x128xf32> to vector<1x128xf32>
    %7 = vector.broadcast %5 : vector<2x1xf32> to vector<2x128xf32>
    %8 = vector.broadcast %6 : vector<1x128xf32> to vector<2x128xf32>
    %9 = arith.mulf %7, %8 : vector<2x128xf32>
    %10 = arith.addf %4, %9 : vector<2x128xf32>
    %11 = vector.extract_strided_slice %0 {offsets = [0, 1], sizes = [2, 1], strides = [1, 1]} : vector<2x2xf32> to vector<2x1xf32>
    %12 = vector.extract_strided_slice %1 {offsets = [1, 0], sizes = [1, 128], strides = [1, 1]} : vector<2x128xf32> to vector<1x128xf32>
    %13 = vector.broadcast %11 : vector<2x1xf32> to vector<2x128xf32>
    %14 = vector.broadcast %12 : vector<1x128xf32> to vector<2x128xf32>
    %15 = arith.mulf %13, %14 : vector<2x128xf32>
    %16 = arith.addf %10, %15 : vector<2x128xf32>
    %c0_7 = arith.constant 0 : index
    %c0_8 = arith.constant 0 : index
    %17 = vector.load %arg5[%c0_7, %c0_8] : memref<1x128xf32, #tpu.memory_space<vmem>>, vector<1x128xf32>
    %18 = vector.broadcast %17 : vector<1x128xf32> to vector<2x128xf32>
    %19 = arith.addf %16, %18 : vector<2x128xf32>
    %cst_9 = arith.constant 0.000000e+00 : f32
    %20 = vector.broadcast %cst_9 : f32 to vector<2x128xf32>
    %21 = arith.maximumf %19, %20 : vector<2x128xf32>
    %c0_10 = arith.constant 0 : index
    %c0_11 = arith.constant 0 : index
    %22 = vector.load %arg6[%c0_10, %c0_11] : memref<128x32xf32, #tpu.memory_space<vmem>>, vector<128x32xf32>
    %cst_12 = arith.constant dense<0.000000e+00> : vector<2x32xf32>
    %23 = tpu.matmul %21, %22, %cst_12 {dimension_numbers = #tpu.dot_dimension_numbers<[1], [0], [0], [1], [0, 0, 1, 1], [], []>} : vector<2x128xf32>, vector<128x32xf32>, vector<2x32xf32> -> vector<2x32xf32>
    %c0_13 = arith.constant 0 : index
    %c0_14 = arith.constant 0 : index
    %24 = vector.load %arg7[%c0_13, %c0_14] : memref<1x32xf32, #tpu.memory_space<vmem>>, vector<1x32xf32>
    %25 = vector.broadcast %24 : vector<1x32xf32> to vector<2x32xf32>
    %26 = arith.addf %23, %25 : vector<2x32xf32>
    %c0_15 = arith.constant 0 : index
    %c0_16 = arith.constant 0 : index
    %27 = vector.load %arg8[%c0_15, %c0_16] : memref<2x32xf32, #tpu.memory_space<vmem>>, vector<2x32xf32>
    tpu.vector_store %arg8[%c0_15, %c0_16], %26 {strides = array<i32>} : memref<2x32xf32, #tpu.memory_space<vmem>>, vector<2x32xf32>,
    return
  }
  func.func @transform_0(%arg0: i32) -> (i32, i32) {
    %c0_i32 = arith.constant 0 : i32
    %c0_i32_0 = arith.constant 0 : i32
    return %arg0, %c0_i32 : i32, i32
  }
  func.func @transform_1(%arg0: i32) -> (i32, i32) {
    %c0_i32 = arith.constant 0 : i32
    %c0_i32_0 = arith.constant 0 : i32
    return %arg0, %c0_i32 : i32, i32
  }
  func.func @transform_2(%arg0: i32) -> (i32, i32) {
    %c0_i32 = arith.constant 0 : i32
    %c0_i32_0 = arith.constant 0 : i32
    %c0_i32_1 = arith.constant 0 : i32
    return %c0_i32, %c0_i32_0 : i32, i32
  }
  func.func @transform_3(%arg0: i32) -> (i32, i32) {
    %c0_i32 = arith.constant 0 : i32
    %c0_i32_0 = arith.constant 0 : i32
    %c0_i32_1 = arith.constant 0 : i32
    return %c0_i32, %c0_i32_0 : i32, i32
  }
  func.func @transform_4(%arg0: i32) -> (i32, i32) {
    %c0_i32 = arith.constant 0 : i32
    %c0_i32_0 = arith.constant 0 : i32
    %c0_i32_1 = arith.constant 0 : i32
    return %c0_i32, %c0_i32_0 : i32, i32
  }
  func.func @transform_5(%arg0: i32) -> (i32, i32) {
    %c0_i32 = arith.constant 0 : i32
    %c0_i32_0 = arith.constant 0 : i32
    %c0_i32_1 = arith.constant 0 : i32
    return %c0_i32, %c0_i32_0 : i32, i32
  }
  func.func @transform_6(%arg0: i32) -> (i32, i32) {
    %c0_i32 = arith.constant 0 : i32
    %c0_i32_0 = arith.constant 0 : i32
    %c0_i32_1 = arith.constant 0 : i32
    return %c0_i32, %c0_i32_0 : i32, i32
  }
  func.func @transform_7(%arg0: i32) -> (i32, i32) {
    %c0_i32 = arith.constant 0 : i32
    %c0_i32_0 = arith.constant 0 : i32
    return %arg0, %c0_i32 : i32, i32
  }
}

</mosaic_0001>

<bundles_post_ra>
// kernel: predictor_forward.1
= control target key start
LH: loop header
LB: loop body
LE: loop exit
PB: predicated region body
PF: predicated region fallthrough
CT: control target
= control target key end

     0   :  { %v379_v3 = vmov 0.0|0.0   ;;  %vm380_vm0 = vmmov 0   ;;  %v381_v6 = vmov 0.0   ;;  %v382_v7 = vmov 0   ;;  %s514_s0 = inlined_call_operand.vmem [shape: f32[2,32], index: 0, kind: input, shape index: {}]   ;;  %s515_s1 = inlined_call_operand.vmem [shape: f32[2,2], index: 1, kind: input, shape index: {}]   ;;  %s516_s2 = inlined_call_operand.vmem [shape: f32[32,128], index: 2, kind: input, shape index: {}]   ;;  %s517_s3 = inlined_call_operand.vmem [shape: f32[2,128], index: 3, kind: input, shape index: {}]   ;;  %s518_s4 = inlined_call_operand.vmem [shape: f32[1,128], index: 4, kind: input, shape index: {}]   ;;  %s519_s5 = inlined_call_operand.vmem [shape: f32[128,32], index: 5, kind: input, shape index: {}]   ;;  %s520_s6 = inlined_call_operand.vmem [shape: f32[1,32], index: 6, kind: input, shape index: {}]   ;;  %s521_s7 = inlined_call_operand.hbm [shape: f32[2,32], index: 7, kind: output, shape index: {}]  }
   0x1   :  { %v30_v0 = vld [vmem:[%s516_s2] sm:$0xff]  ;;  %v31_v1 = vld [vmem:[%s516_s2 + $0x8] sm:$0xff]  ;;  %v32_v2 = vld [vmem:[%s516_s2 + $0x10] sm:$0xff]  ;;  %317 = vmatprep.subr.bf16.mxu0 %v379_v3  ;;  %279 = vmatprep.mubr.msk.f32.mxu0 %vm380_vm0, %v381_v6 }
   0x2   :  { %v318_v4 = vpack.c.bf16 %v31_v1, %v30_v0  ;;  %v33_v5 = vld [vmem:[%s516_s2 + $0x18] sm:$0xff]  ;;  %353 = vset.pattern.permute.xlu0 %v382_v7  ;;  %v27_v8 = vld [vmem:[%s515_s1] sm:$0x3]  ;;  %323 = vmatprep.subr.bf16.mxu1 %v379_v3  ;;  %v138_v10 = vld [vmem:[%s519_s5 + $0x8] sm:$0xff] }
   0x3   :  { %v137_v9 = vld [vmem:[%s519_s5] sm:$0xff]  ;;  %v321_v11 = vpack.c.bf16 %v33_v5, %v32_v2  ;;  %36 = vperm.xlu0 %353, %v27_v8   ;;  %v139_v13 = vld [vmem:[%s519_s5 + $0x10] sm:$0xff]  ;;  %v140_v14 = vld [vmem:[%s519_s5 + $0x18] sm:$0xff]  ;;  %314 = vmatprep.mubr.msk.f32.mxu1 %vm380_vm0, %v381_v6 }
   0x4   :  { %319 = vmatpush3.bf16.msra.mxu0 %v318_v4  ;;  %v324_v12 = vpack.c.bf16 %v138_v10, %v137_v9  ;;  %v327_v15 = vpack.c.bf16 %v140_v14, %v139_v13  ;;  %v141_v16 = vld [vmem:[%s519_s5 + $0x20] sm:$0xff]  ;;  %v142_v17 = vld [vmem:[%s519_s5 + $0x28] sm:$0xff] }
   0x5   :  { %320 = vmatprep.subr.bf16.mxu0 %v379_v3 }
   0x6   :  { %325 = vmatpush3.bf16.msra.mxu1 %v324_v12 }
   0x7   :  { %326 = vmatprep.subr.bf16.mxu1 %v379_v3 }
   0x8   :  { %12 = vsyncpa [#allocation3], 0  ;;  %322 = vmatpush3.bf16.msra.mxu0 %v321_v11  ;;  %v29_v18 = vld [vmem:[%s514_s0] sm:$0x3]  ;;  %vm44_vm1 = vcmask 261120   ;;  %v383_v19 = vmov 1   ;;  %v330_v20 = vpack.c.bf16 %v142_v17, %v141_v16  ;;  %v39_v36 = vlaneseq }
   0x9   :  { %354 = vset.pattern.permute.xlu0 %v383_v19  ;;  %v143_v21 = vld [vmem:[%s519_s5 + $0x30] sm:$0xff]  ;;  %v144_v22 = vld [vmem:[%s519_s5 + $0x38] sm:$0xff]  ;;  %v145_v24 = vld [vmem:[%s519_s5 + $0x40] sm:$0xff]  ;;  %vm230_vm2 = vcmask 254976  }
   0xa   :  { %119 = vperm.xlu0 %354, %v27_v8   ;;  %328 = vmatpush3.bf16.msra.mxu1 %v327_v15  ;;  %v333_v23 = vpack.c.bf16 %v144_v22, %v143_v21  ;;  %v146_v25 = vld [vmem:[%s519_s5 + $0x48] sm:$0xff]  ;;  %v147_v27 = vld [vmem:[%s519_s5 + $0x50] sm:$0xff]  ;;  %v148_v28 = vld [vmem:[%s519_s5 + $0x58] sm:$0xff]  ;;  %v40_v37 = vshrl.u32 %v39_v36, 7 }
   0xb   :  { %280 = vmatmul.mubr.msk.f32.vlgmr.msra.gmra.mrb[0].mxu0 %vm44_vm1, %v29_v18  ;;  %329 = vmatprep.subr.bf16.mxu1 %v379_v3  ;;  %v336_v26 = vpack.c.bf16 %v146_v25, %v145_v24  ;;  %v339_v29 = vpack.c.bf16 %v148_v28, %v147_v27  ;;  %v149_v30 = vld [vmem:[%s519_s5 + $0x60] sm:$0xff]  ;;  %v150_v31 = vld [vmem:[%s519_s5 + $0x68] sm:$0xff]  ;;  %v151_v33 = vld [vmem:[%s519_s5 + $0x70] sm:$0xff] }
   0xc   :  { %v342_v32 = vpack.c.bf16 %v150_v31, %v149_v30  ;;  %v152_v34 = vld [vmem:[%s519_s5 + $0x78] sm:$0xff]  ;;  %v41_v39 = vsub.s32 0, %v40_v37  ;;  %v124_v40 = vsub.s32 1, %v40_v37  ;;  %v28_v41 = vld [vmem:[%s517_s3] sm:$0x3]  ;;  %s384_s3 = smov [#allocation2]  }
   0xd   :  { %v345_v35 = vpack.c.bf16 %v152_v34, %v151_v33  ;;  %v247_v50 = vld [vmem:[%s518_s4] ss:$0 sm:$0xff]  ;;  %s238_s22 = sshll.u32 %s384_s3, 4  ;;  %s239_s22 = int_to_ptr.vmem [resolvable:$true] %s238_s22 }
   0xe   :  { %331 = vmatpush3.bf16.msra.mxu1 %v330_v20  ;;  %v42_v42 = vrot.slane %v28_v41, %v41_v39  ;;  %v125_v43 = vrot.slane %v28_v41, %v124_v40  ;;  %v248_v54 = vld [vmem:[%s520_s6] ss:$0 sm:$0xff]  ;;  %s355_s23 = scalar_lea.vmem %s239_s22, 32  ;;  %p360_p1 = scmp.lt.s32.totalorder %s239_s22, %s239_s22 }
   0xf   :  { %332 = vmatprep.subr.bf16.mxu1 %v379_v3  ;;  %p356_p0 = scmp.ne.s32.totalorder %s239_s22, %s355_s23  ;;  %p361_p2 = scmp.lt.s32.totalorder %s355_s23, %s355_s23 }
  0x11   :  { %p362_p3 = por %p361_p2, %p360_p1 }
  0x12   :  { %334 = vmatpush3.bf16.msra.mxu1 %v333_v23 }
  0x13   :  { %335 = vmatprep.subr.bf16.mxu1 %v379_v3  ;;  %p363_p4 = pnand %p362_p3, %p356_p0 }
  0x16   :  { %337 = vmatpush3.bf16.msra.mxu1 %v336_v26 }
  0x17   :  { %338 = vmatprep.subr.bf16.mxu1 %v379_v3 }
  0x1a   :  { %340 = vmatpush3.bf16.msra.mxu1 %v339_v29 }
  0x1b   :  { %341 = vmatprep.subr.bf16.mxu1 %v379_v3 }
  0x1e   :  { %343 = vmatpush3.bf16.msra.mxu1 %v342_v32 }
  0x1f   :  { %344 = vmatprep.subr.bf16.mxu1 %v379_v3 }
  0x22   :  { %346 = vmatpush3.bf16.msra.mxu1 %v345_v35 }
  0x82   :  { %v37_v38 = vpop.permute.xlu0 %36 }
  0x83   :  { %v43_v45 = vmul.f32 %v42_v42, %v37_v38 }
  0x89   :  { %v120_v44 = vpop.permute.xlu0 %119 }
  0x8a   :  { %v126_v46 = vmul.f32 %v125_v43, %v120_v44 }
  0xde   :  { %v114_v47 = vpop.f32.mrb[0].mxu0 }
  0xdf   :  { %v115_v48 = vadd.f32 %v114_v47, %v43_v45  ;;  %v281_v49 = vpop.f32.mrb[1].mxu0 }
  0xe1   :  { %v127_v51 = vadd.f32 %v126_v46, %v115_v48 }
  0xe3   :  { %v135_v52 = vadd.f32 %v247_v50, %v127_v51 }
  0xe5   :  { %v136_v53 = vmax.f32 %v135_v52, 0.0 }
  0xe7   :  { %315 = vmatmul.mubr.f32.vlgmr.msra.gmra.mrb[0].mxu1 %v136_v53 }
 0x1ba   :  { %v226_v55 = vpop.f32.mrb[0].mxu1 }
 0x1bb   :  { %v227_v56 = vadd.f32 %v248_v54, %v226_v55  ;;  %v316_v57 = vpop.f32.mrb[1].mxu1 }
 0x1bd   :  { %231 = vst.msk [vmem:[#allocation2] sm:$0x3] %vm230_vm2, %v227_v56 }
 0x1be   :  { %366 = shalt.err (!%p363_p4)
}
 0x1bf   :  { %s367_s25 = scalar_lea.hbm %s521_s7, 32 }
 0x1c0   :  { %p368_p5 = scmp.ne.s32.totalorder %s521_s7, %s367_s25  ;;  %p371_p6 = scmp.lt.u32.totalorder %s367_s25, %s521_s7 }
 0x1c2   :  { %p373_p7 = pnand %p371_p6, %p368_p5 }
 0x1c4   :  { %376 = shalt.err (!%p373_p7)
}
 0x1c5   :  { %241 = dma.vmem_to_hbm [thread:$0]  %s239_s22, 32, %s521_s7, [#allocation3]  }
 0x1c6   :  { %377 = dma.done.wait [#allocation3], 32  }
 0x1c7   :  { %378 = vsyncadd [#allocation3], 4294967264 }
 0x1c8   :  { %245 = vsyncpa [#allocation3], 1 }

</bundles_post_ra>
